<compile_context>
chip_gen: v7x
topology: tpu7x:2x2x1
jax: 0.10.0
libtpu: 0.0.40
codegen_flags: <defaults>
</compile_context>

<pallas_src>
import functools

import jax
import jax.numpy as jnp
from jax.experimental import pallas as pl
from jax.experimental.pallas import tpu as pltpu


# ----------------------------- small helpers ---------------------------------

def _round_up(a, b):
    return ((a + b - 1) // b) * b


def _leaky_relu(x, slope=0.01):
    return jnp.where(x > 0, x, slope * x)


def _instance_norm_rows(z, inv_n, eps=1e-5):
    # Per-row (= per (n, c) instance) stats over the lane-flattened spatial
    # elements.  Padded lanes are exactly zero so they do not perturb the sums;
    # divide by the REAL element count (inv_n).  Single pass, f32, var clamped.
    s1 = jnp.sum(z, axis=1, keepdims=True)
    s2 = jnp.sum(z * z, axis=1, keepdims=True)
    mu = s1 * inv_n
    var = jnp.maximum(s2 * inv_n - mu * mu, 0.0)
    return (z - mu) * jax.lax.rsqrt(var + eps)


# --------------------------------- kernel ------------------------------------

def _de_lora_kernel(x_ref, t1_ref, wk_ref, t2_ref, o_ref, *, n_sp1, n_sp2, tile_reps):
    f32, bf16 = jnp.float32, jnp.bfloat16
    l2p = o_ref.shape[1]

    x = x_ref[...]                                                   # (bt, H) f32

    # conv1: banded Toeplitz MXU matmul, bf16 operands, f32 accumulation.
    h1 = jnp.dot(x.astype(bf16), t1_ref[...],
                 preferred_element_type=f32)                         # (bt, H)
    h1 = _instance_norm_rows(h1, 1.0 / n_sp1)                        # norm1 (f32)

    # qkv merged-LoRA linear, emitted directly in the padded channel-major layout.
    z = jnp.dot(h1.astype(bf16), wk_ref[...],
                preferred_element_type=f32)                          # (bt, L2p)
    z = _leaky_relu(z)

    # conv2: banded block-Toeplitz MXU matmul over the (3C, H) plane.
    h2 = jnp.dot(z.astype(bf16), t2_ref[...],
                 preferred_element_type=f32)                         # (bt, L2p)
    h2 = _instance_norm_rows(h2, 1.0 / n_sp2)                        # norm2 (f32)

    # Residual: original input broadcast across the 3C channel groups.  In the
    # channel-major lane layout (q = j*H + y) this is a plain lane tiling of x —
    # no weight matrix, no MXU pass.  Padded output lanes hold junk; sliced off
    # in the wrapper.
    res = jnp.tile(x, (1, tile_reps))[:, :l2p]                       # (bt, L2p) f32
    o_ref[...] = _leaky_relu(h2 + res)                               # dense vst


# ------------------ wrapper-built (cached) weight matrices --------------------

def _merged_qkv_weight(params):
    # loralib.MergedLinear(C, 3C, enable_lora=[True, True, False]): lora_ind marks
    # the contiguous q rows [0:C] and k rows [C:2C], so zero_pad == block-concat.
    wqkv = params["wqkv"]                         # (3C, C)
    A, B = params["lora_A"], params["lora_B"]     # (2r, C), (2C, r)
    cout = wqkv.shape[1]
    r = A.shape[0] // 2
    scaling = params["lora_alpha"] / r
    dq = B[:cout] @ A[:r]
    dk = B[cout:] @ A[r:]
    delta = jnp.concatenate([dq, dk, jnp.zeros_like(dq)], axis=0)
    return wqkv + scaling * delta                 # (3C, C)


def _toeplitz_1d(taps, h):
    # T1[i(in), j(out)] = taps[i - j + pad] inside the band, else 0 -> conv1 = x @ T1.
    k = taps.shape[0]
    pad = k // 2
    d = jnp.arange(h)[:, None] - jnp.arange(h)[None, :] + pad
    valid = (d >= 0) & (d < k)
    return jnp.where(valid, taps[jnp.clip(d, 0, k - 1)], 0.0)


def _qkv_matrix_cm(w_eff, h, l2p):
    # Channel-major layout q = j*H + y:  Wk[y, q] = W_eff[j, 0] if q % H == y (and
    # q inside the real 3C*H range), else 0.  Padded rows/cols are zero.
    w2c = w_eff.shape[0]
    l2 = h * w2c
    q = jnp.arange(l2p)
    same = (jnp.arange(h)[:, None] == (q % h)[None, :]) & (q < l2)[None, :]
    vals = w_eff[jnp.clip(q // h, 0, w2c - 1), 0][None, :]
    return jnp.where(same, vals, 0.0)


def _conv2_matrix_cm(taps2, h, w2c, l2p):
    # T2[p(in), q(out)] = taps2[dy, dx] with dy = y_in - y_out + pad (H axis),
    # dx = x_in - x_out + pad (3C axis); channel-major index idx = x*H + y.
    k = taps2.shape[0]
    pad = k // 2
    l2 = h * w2c
    p = jnp.arange(l2p)
    q = jnp.arange(l2p)
    dy = (p % h)[:, None] - (q % h)[None, :] + pad
    dx = (p // h)[:, None] - (q // h)[None, :] + pad
    valid = ((dy >= 0) & (dy < k) & (dx >= 0) & (dx < k)
             & (p < l2)[:, None] & (q < l2)[None, :])
    vals = taps2[jnp.clip(dy, 0, k - 1), jnp.clip(dx, 0, k - 1)]
    return jnp.where(valid, vals, 0.0)


def prepare_de_lora_weights(params, x_shape):
    """Build the fused weight matrices ONCE per weight update (hoisted out of the
    per-forward path).  Matmul operands are stored in bf16."""
    n, cin, h, w = x_shape
    w1, w2 = params["w1"], params["w2"]
    cout, w1_cin, k, _ = w1.shape

    # Shape constraints implied by the PyTorch forward (nn.Linear on the last
    # axis, then `out += residual` with the original input).
    assert w == cout, "qkv Linear acts on last axis: requires W == out_channels"
    assert cout == 1 and w == 1, "residual broadcast forces out_channels == W == 1"
    assert cin == 1 and w1_cin == cin, "residual channel broadcast forces in_channels == 1"

    pad = k // 2
    w2c = 3 * cout
    l2 = h * w2c
    l2p = max(_round_up(l2, 128), 128)            # lane-dense output width
    f32, bf16 = jnp.float32, jnp.bfloat16

    # conv1: with W == 1 only the centre column of the kxk taps touches data -> a
    # 1-D conv along H folded into a banded Toeplitz matrix.
    t1 = _toeplitz_1d(w1[0, 0, :, pad].astype(f32), h)               # (H, H)
    # qkv MergedLinear with LoRA merged, emitted in the padded channel-major layout.
    w_eff = _merged_qkv_weight(params).astype(f32)                   # (3C, C)
    wk = _qkv_matrix_cm(w_eff, h, l2p)                               # (H, L2p)
    # conv2: full kxk conv over the (H, 3C) plane as one banded block-Toeplitz.
    t2 = _conv2_matrix_cm(w2[0, 0].astype(f32), h, w2c, l2p)         # (L2p, L2p)

    return dict(t1=t1.astype(bf16), wk=wk.astype(bf16), t2=t2.astype(bf16),
                h=h, w2c=w2c, l2=l2, l2p=l2p, cout=cout)


# --------------------------------- wrapper ------------------------------------

def de_lora_block(x, prep):
    n = x.shape[0]
    h, w2c, l2, l2p, cout = prep["h"], prep["w2c"], prep["l2"], prep["l2p"], prep["cout"]
    f32 = jnp.float32

    x2 = x.reshape(n, h).astype(f32)              # (N, H): cin == W == 1, H on lanes

    # Batch tiling: pad N to a multiple of 8, tile up to 128 sublane rows, and keep
    # >= 2 "parallel" grid steps whenever N allows (v7x megacore; neutral elsewhere).
    n_pad = _round_up(max(n, 8), 8)
    bt = min(n_pad, 128)
    if n_pad // bt < 2 and n_pad >= 16:
        bt = _round_up(n_pad // 2, 8)
    n_pad = _round_up(n_pad, bt)
    if n_pad != n:
        x2 = jnp.concatenate([x2, jnp.zeros((n_pad - n, h), f32)], axis=0)
    grid = (n_pad // bt,)

    kernel = functools.partial(_de_lora_kernel, n_sp1=h, n_sp2=l2,
                               tile_reps=pl.cdiv(l2p, h))

    out_flat = pl.pallas_call(
        kernel,
        out_shape=jax.ShapeDtypeStruct((n_pad, l2p), f32),
        grid=grid,
        in_specs=[
            pl.BlockSpec((bt, h), lambda i: (i, 0)),         # x (f32, VMEM)
            pl.BlockSpec((h, h), lambda i: (0, 0)),          # conv1 Toeplitz (bf16)
            pl.BlockSpec((h, l2p), lambda i: (0, 0)),        # merged qkv (bf16)
            pl.BlockSpec((l2p, l2p), lambda i: (0, 0)),      # conv2 block-Toeplitz (bf16)
        ],
        out_specs=pl.BlockSpec((bt, l2p), lambda i: (i, 0)),
        compiler_params=pltpu.CompilerParams(
            dimension_semantics=("parallel",),
            vmem_limit_bytes=32 * 1024 * 1024),
    )(x2, prep["t1"], prep["wk"], prep["t2"])

    # Drop batch/lane padding and restore the module's (N, C_out, H, 3C) layout.
    out = out_flat[:n, :l2].reshape(n, w2c, h)
    return jnp.transpose(out, (0, 2, 1)).reshape(n, cout, h, w2c)


# ------------------------------ pure-JAX reference -----------------------------

def reference_forward(x, params):
    w1, b1, w2, b2 = params["w1"], params["b1"], params["w2"], params["b2"]
    k = w1.shape[2]
    pad = k // 2
    hp = jax.lax.Precision.HIGHEST
    w_eff_t = _merged_qkv_weight(params).T

    def conv(z, w, b):
        y = jax.lax.conv_general_dilated(
            z, w, window_strides=(1, 1), padding=[(pad, pad), (pad, pad)],
            dimension_numbers=("NCHW", "OIHW", "NCHW"), precision=hp)
        return y + b[None, :, None, None]

    def inorm(z, eps=1e-5):
        mu = z.mean(axis=(2, 3), keepdims=True)
        var = ((z - mu) ** 2).mean(axis=(2, 3), keepdims=True)
        return (z - mu) * jax.lax.rsqrt(var + eps)

    lr = lambda z: jnp.where(z > 0, z, 0.01 * z)

    out = inorm(conv(x, w1, b1))
    out = lr(jnp.matmul(out, w_eff_t, precision=hp))   # Linear on last axis
    out = inorm(conv(out, w2, b2))
    return lr(out + x)                                 # residual broadcast + lrelu


# ----------------------------------- main --------------------------------------

if __name__ == "__main__":
    key = jax.random.PRNGKey(0)
    N, C_IN, H = 12, 1, 16
    C_OUT, K, R, LORA_ALPHA = 1, 3, 4, 1
    W = C_OUT   # forced by `qkv` (nn.Linear on the last axis) in the original forward

    ks = jax.random.split(key, 8)
    x = jax.random.normal(ks[0], (N, C_IN, H, W), jnp.float32)

    # deterministic synthetic parameters (loralib's default lora_B=0 would make the
    # LoRA branch a no-op, so nonzero values are used to actually exercise it)
    params = dict(
        w1=0.3 * jax.random.normal(ks[1], (C_OUT, C_IN, K, K), jnp.float32),
        b1=0.1 * jax.random.normal(ks[2], (C_OUT,), jnp.float32),
        wqkv=0.3 * jax.random.normal(ks[3], (3 * C_OUT, C_OUT), jnp.float32),
        lora_A=0.3 * jax.random.normal(ks[4], (2 * R, C_OUT), jnp.float32),
        lora_B=0.3 * jax.random.normal(ks[5], (2 * C_OUT, R), jnp.float32),
        lora_alpha=float(LORA_ALPHA),
        w2=0.3 * jax.random.normal(ks[6], (C_OUT, C_OUT, K, K), jnp.float32),
        b2=0.1 * jax.random.normal(ks[7], (C_OUT,), jnp.float32),
    )

    # Weight matrices built once (per weight update), out of the forward path.
    prep = prepare_de_lora_weights(params, x.shape)

    out = de_lora_block(x, prep)
    out = jax.block_until_ready(out)
    ref = reference_forward(x, params)

    assert out.shape == (N, C_OUT, H, 3 * C_OUT)
    # bf16 MXU operands (f32 accumulation) vs the f32 HIGHEST reference -> relaxed
    # tolerance (per perf review; bit-parity with f32 is not required).
    if not jnp.allclose(out, ref, atol=5e-2, rtol=5e-2):
        raise SystemExit("Pallas kernel does not match JAX reference")
    print("KERNEL_OK")
</pallas_src>

<mosaic_0001>
module attributes {stable_mosaic.version = 11 : i64} {
  func.func @_de_lora_kernel(%arg0: i32, %arg1: memref<8x16xf32, #tpu.memory_space<vmem>>, %arg2: memref<16x16xbf16, #tpu.memory_space<vmem>>, %arg3: memref<16x128xbf16, #tpu.memory_space<vmem>>, %arg4: memref<128x128xbf16, #tpu.memory_space<vmem>>, %arg5: memref<8x128xf32, #tpu.memory_space<vmem>>) attributes {dimension_semantics = [#tpu.dimension_semantics<parallel>], iteration_bounds = array<i64: 2>, scalar_prefetch = 0 : i64, scratch_operands = 0 : i64, tpu.core_type = #tpu.core_type<tc>, window_params = [{transform_indices = @transform_0, window_bounds = array<i64: 8, 16>}, {pipeline_mode = #tpu.pipeline_mode<synchronous>, transform_indices = @transform_1, window_bounds = array<i64: 16, 16>}, {pipeline_mode = #tpu.pipeline_mode<synchronous>, transform_indices = @transform_2, window_bounds = array<i64: 16, 128>}, {pipeline_mode = #tpu.pipeline_mode<synchronous>, transform_indices = @transform_3, window_bounds = array<i64: 128, 128>}, {transform_indices = @transform_4, window_bounds = array<i64: 8, 128>}]} {
    %c0 = arith.constant 0 : index
    %c0_0 = arith.constant 0 : index
    %0 = vector.load %arg1[%c0, %c0_0] : memref<8x16xf32, #tpu.memory_space<vmem>>, vector<8x16xf32>
    %1 = arith.truncf %0 : vector<8x16xf32> to vector<8x16xbf16>
    %c0_1 = arith.constant 0 : index
    %c0_2 = arith.constant 0 : index
    %2 = vector.load %arg2[%c0_1, %c0_2] : memref<16x16xbf16, #tpu.memory_space<vmem>>, vector<16x16xbf16>
    %cst = arith.constant dense<0.000000e+00> : vector<8x16xf32>
    %3 = tpu.matmul %1, %2, %cst {dimension_numbers = #tpu.dot_dimension_numbers<[1], [0], [0], [1], [0, 0, 1, 1], [], []>} : vector<8x16xbf16>, vector<16x16xbf16>, vector<8x16xf32> -> vector<8x16xf32>
    %cst_3 = arith.constant dense<0.000000e+00> : vector<8xf32>
    %4 = vector.multi_reduction <add>, %3, %cst_3 [1] : vector<8x16xf32> to vector<8xf32>
    %5 = vector.shape_cast %4 : vector<8xf32> to vector<8x1xf32>
    %6 = arith.mulf %3, %3 : vector<8x16xf32>
    %cst_4 = arith.constant dense<0.000000e+00> : vector<8xf32>
    %7 = vector.multi_reduction <add>, %6, %cst_4 [1] : vector<8x16xf32> to vector<8xf32>
    %8 = vector.shape_cast %7 : vector<8xf32> to vector<8x1xf32>
    %cst_5 = arith.constant 6.250000e-02 : f32
    %9 = vector.broadcast %cst_5 : f32 to vector<8x1xf32>
    %10 = arith.mulf %5, %9 : vector<8x1xf32>
    %cst_6 = arith.constant 6.250000e-02 : f32
    %11 = vector.broadcast %cst_6 : f32 to vector<8x1xf32>
    %12 = arith.mulf %8, %11 : vector<8x1xf32>
    %13 = arith.mulf %10, %10 : vector<8x1xf32>
    %14 = arith.subf %12, %13 : vector<8x1xf32>
    %cst_7 = arith.constant 0.000000e+00 : f32
    %15 = vector.broadcast %cst_7 : f32 to vector<8x1xf32>
    %16 = arith.maximumf %14, %15 : vector<8x1xf32>
    %17 = vector.broadcast %10 : vector<8x1xf32> to vector<8x16xf32>
    %18 = arith.subf %3, %17 : vector<8x16xf32>
    %cst_8 = arith.constant 9.99999974E-6 : f32
    %19 = vector.broadcast %cst_8 : f32 to vector<8x1xf32>
    %20 = arith.addf %16, %19 : vector<8x1xf32>
    %21 = math.rsqrt %20 : vector<8x1xf32>
    %22 = vector.broadcast %21 : vector<8x1xf32> to vector<8x16xf32>
    %23 = arith.mulf %18, %22 : vector<8x16xf32>
    %24 = arith.truncf %23 : vector<8x16xf32> to vector<8x16xbf16>
    %c0_9 = arith.constant 0 : index
    %c0_10 = arith.constant 0 : index
    %25 = vector.load %arg3[%c0_9, %c0_10] : memref<16x128xbf16, #tpu.memory_space<vmem>>, vector<16x128xbf16>
    %cst_11 = arith.constant dense<0.000000e+00> : vector<8x128xf32>
    %26 = tpu.matmul %24, %25, %cst_11 {dimension_numbers = #tpu.dot_dimension_numbers<[1], [0], [0], [1], [0, 0, 1, 1], [], []>} : vector<8x16xbf16>, vector<16x128xbf16>, vector<8x128xf32> -> vector<8x128xf32>
    %cst_12 = arith.constant 0.000000e+00 : f32
    %27 = vector.broadcast %cst_12 : f32 to vector<8x128xf32>
    %28 = arith.cmpf ogt, %26, %27 : vector<8x128xf32>
    %cst_13 = arith.constant 0.00999999977 : f32
    %29 = vector.broadcast %cst_13 : f32 to vector<8x128xf32>
    %30 = arith.mulf %29, %26 : vector<8x128xf32>
    %31 = arith.select %28, %26, %30 : vector<8x128xi1>, vector<8x128xf32>
    %32 = arith.truncf %31 : vector<8x128xf32> to vector<8x128xbf16>
    %c0_14 = arith.constant 0 : index
    %c0_15 = arith.constant 0 : index
    %33 = vector.load %arg4[%c0_14, %c0_15] : memref<128x128xbf16, #tpu.memory_space<vmem>>, vector<128x128xbf16>
    %cst_16 = arith.constant dense<0.000000e+00> : vector<8x128xf32>
    %34 = tpu.matmul %32, %33, %cst_16 {dimension_numbers = #tpu.dot_dimension_numbers<[1], [0], [0], [1], [0, 0, 1, 1], [], []>} : vector<8x128xbf16>, vector<128x128xbf16>, vector<8x128xf32> -> vector<8x128xf32>
    %cst_17 = arith.constant dense<0.000000e+00> : vector<8xf32>
    %35 = vector.multi_reduction <add>, %34, %cst_17 [1] : vector<8x128xf32> to vector<8xf32>
    %36 = vector.shape_cast %35 : vector<8xf32> to vector<8x1xf32>
    %37 = arith.mulf %34, %34 : vector<8x128xf32>
    %cst_18 = arith.constant dense<0.000000e+00> : vector<8xf32>
    %38 = vector.multi_reduction <add>, %37, %cst_18 [1] : vector<8x128xf32> to vector<8xf32>
    %39 = vector.shape_cast %38 : vector<8xf32> to vector<8x1xf32>
    %cst_19 = arith.constant 0.020833334 : f32
    %40 = vector.broadcast %cst_19 : f32 to vector<8x1xf32>
    %41 = arith.mulf %36, %40 : vector<8x1xf32>
    %cst_20 = arith.constant 0.020833334 : f32
    %42 = vector.broadcast %cst_20 : f32 to vector<8x1xf32>
    %43 = arith.mulf %39, %42 : vector<8x1xf32>
    %44 = arith.mulf %41, %41 : vector<8x1xf32>
    %45 = arith.subf %43, %44 : vector<8x1xf32>
    %cst_21 = arith.constant 0.000000e+00 : f32
    %46 = vector.broadcast %cst_21 : f32 to vector<8x1xf32>
    %47 = arith.maximumf %45, %46 : vector<8x1xf32>
    %48 = vector.broadcast %41 : vector<8x1xf32> to vector<8x128xf32>
    %49 = arith.subf %34, %48 : vector<8x128xf32>
    %cst_22 = arith.constant 9.99999974E-6 : f32
    %50 = vector.broadcast %cst_22 : f32 to vector<8x1xf32>
    %51 = arith.addf %47, %50 : vector<8x1xf32>
    %52 = math.rsqrt %51 : vector<8x1xf32>
    %53 = vector.broadcast %52 : vector<8x1xf32> to vector<8x128xf32>
    %54 = arith.mulf %49, %53 : vector<8x128xf32>
    %55 = tpu.concatenate %0, %0, %0, %0, %0, %0, %0, %0 in 1 : vector<8x16xf32>, vector<8x16xf32>, vector<8x16xf32>, vector<8x16xf32>, vector<8x16xf32>, vector<8x16xf32>, vector<8x16xf32>, vector<8x16xf32> -> vector<8x128xf32>
    %56 = arith.addf %54, %55 : vector<8x128xf32>
    %cst_23 = arith.constant 0.000000e+00 : f32
    %57 = vector.broadcast %cst_23 : f32 to vector<8x128xf32>
    %58 = arith.cmpf ogt, %56, %57 : vector<8x128xf32>
    %cst_24 = arith.constant 0.00999999977 : f32
    %59 = vector.broadcast %cst_24 : f32 to vector<8x128xf32>
    %60 = arith.mulf %59, %56 : vector<8x128xf32>
    %61 = arith.select %58, %56, %60 : vector<8x128xi1>, vector<8x128xf32>
    %c0_25 = arith.constant 0 : index
    %c0_26 = arith.constant 0 : index
    %62 = vector.load %arg5[%c0_25, %c0_26] : memref<8x128xf32, #tpu.memory_space<vmem>>, vector<8x128xf32>
    tpu.vector_store %arg5[%c0_25, %c0_26], %61 {strides = array<i32>} : memref<8x128xf32, #tpu.memory_space<vmem>>, vector<8x128xf32>,
    return
  }
  func.func @transform_0(%arg0: i32) -> (i32, i32) {
    %c0_i32 = arith.constant 0 : i32
    %c0_i32_0 = arith.constant 0 : i32
    return %arg0, %c0_i32 : i32, i32
  }
  func.func @transform_1(%arg0: i32) -> (i32, i32) {
    %c0_i32 = arith.constant 0 : i32
    %c0_i32_0 = arith.constant 0 : i32
    %c0_i32_1 = arith.constant 0 : i32
    return %c0_i32, %c0_i32_0 : i32, i32
  }
  func.func @transform_2(%arg0: i32) -> (i32, i32) {
    %c0_i32 = arith.constant 0 : i32
    %c0_i32_0 = arith.constant 0 : i32
    %c0_i32_1 = arith.constant 0 : i32
    return %c0_i32, %c0_i32_0 : i32, i32
  }
  func.func @transform_3(%arg0: i32) -> (i32, i32) {
    %c0_i32 = arith.constant 0 : i32
    %c0_i32_0 = arith.constant 0 : i32
    %c0_i32_1 = arith.constant 0 : i32
    return %c0_i32, %c0_i32_0 : i32, i32
  }
  func.func @transform_4(%arg0: i32) -> (i32, i32) {
    %c0_i32 = arith.constant 0 : i32
    %c0_i32_0 = arith.constant 0 : i32
    return %arg0, %c0_i32 : i32, i32
  }
}

</mosaic_0001>

<bundles_post_ra>
// kernel: tpu_custom_call.1
= control target key start
LH: loop header
LB: loop body
LE: loop exit
PB: predicated region body
PF: predicated region fallthrough
CT: control target
= control target key end

     0   :  { %9 = vsyncpa [#allocation3], 0  ;;  %s1347_s0 = inlined_call_operand.hbm [shape: f32[16,16], index: 0, kind: input, shape index: {}]   ;;  %s1348_s1 = inlined_call_operand.hbm [shape: bf16[16,16], index: 1, kind: input, shape index: {}]   ;;  %s1349_s2 = inlined_call_operand.hbm [shape: bf16[16,128], index: 2, kind: input, shape index: {}]   ;;  %s1350_s3 = inlined_call_operand.hbm [shape: bf16[128,128], index: 3, kind: input, shape index: {}]   ;;  %s1351_s4 = inlined_call_operand.hbm [shape: f32[16,128], index: 4, kind: output, shape index: {}]  }
   0x1   :  { %11 = vsyncpa [#allocation3 + $0x1], 0 }
   0x2   :  { %12 = vsyncpa [#allocation6], 0 }
   0x3   :  { %13 = vsyncpa [#allocation9], 0 }
   0x4   :  { %14 = vsyncpa [#allocation4], 0 }
   0x5   :  { %16 = vsyncpa [#allocation4 + $0x1], 0  ;;  %s1063_s15 = smov 0   ;;  %s1065_s16 = smov 0  }
   0x6   :  { %s1067_s17 = smov 0   ;;  %s1069_s18 = smov 0  }
   0x7 LB: > { %s1084_s19 = sadd.s32 4294967295, %s1020_s18   ;;  %s655_s20 = sadd.s32 4294967294, %s1020_s18   ;;  %s1020_s18 = sphi %s1069_s18, %s1374_s18   ;;  %s1016_s17 = sphi %s1067_s17, %s1373_s17   ;;  %s1012_s16 = sphi %s1065_s16, %s1372_s16   ;;  %s1008_s15 = sphi %s1063_s15, %s1371_s15  }
   0x8   : > { %p42_p0 = scmp.ne.s32.totalorder %s1012_s16, %s1008_s15  ;;  %p1352_p1 = scmp.eq.s32.totalorder %s1084_s19, 0 }
   0x9   : > { %p135_p3 = scmp.eq.s32.totalorder %s655_s20, 1  ;;  %p656_p5 = scmp.ge.s32.totalorder %s1020_s18, 1 }
   0xa   : > { %p1093_p4 = por %p1352_p1, %p42_p0  ;;  %p142_p7 = scmp.lt.s32.totalorder %s1020_s18, 3 }
   0xb   : > { %p1098_p6 = por %p135_p3, %p42_p0  ;;  %s1022_s24 = smov [#allocation5]  }
   0xc   : > { %s1355_s21 = scalar_select %p1093_p4, 1, 0 }
   0xd   : > { %s1356_s22 = scalar_select %p1098_p6, 1, 0 }
   0xe   : > { %p1103_p8 = pnand %p656_p5, %p142_p7  ;;  %s154_s25 = sshll.u32 %s1022_s24, 4  ;;  %s1107_s25 = int_to_ptr.vmem [resolvable:$true] %s154_s25 }
   0xf   : > { %s1023_s27 = smov [#allocation7]   ;;  %s1024_s29 = smov [#allocation8]  }
  0x10   : > { %s1357_s23 = scalar_select %p1103_p8, 1, 0 }
  0x11   : > { %p746_p9 = pneg %p1103_p8  ;;  %s167_s28 = sshll.u32 %s1023_s27, 4  ;;  %s1118_s28 = int_to_ptr.vmem [resolvable:$true] %s167_s28 }
  0x12   : > { %s1120_s30 = sshll.u32 %s1024_s29, 4  ;;  %s832_s7 = scalar_lea.hbm %s1348_s1, 128  ;;  %s181_s30 = int_to_ptr.vmem [resolvable:$true] %s1120_s30 }
  0x13   : > { %p1114_p11 = pnand %p746_p9, %p1352_p1  ;;  %p833_p12 = scmp.ne.s32.totalorder %s1348_s1, %s832_s7 }
  0x14   : > { %p839_p5 = scmp.lt.u32.totalorder %s832_s7, %s1348_s1 }
  0x15   : > { %p1130_p13 = pneg %p1114_p11 }
  0x17   : > { %p835_p0 = pnand %p1130_p13, %p833_p12 }
  0x19   : > { %p836_p3 = pneg %p835_p0 }
  0x1b   : > { %p841_p7 = pnand %p839_p5, %p836_p3 }
  0x1d   : > { %844 = shalt.err (!%p841_p7)
}
  0x1e   : > { %s845_s13 = scalar_lea.vmem %s1107_s25, 128  ;;  %p853_p2 = scmp.lt.s32.totalorder %s1107_s25, %s1107_s25 }
  0x1f   : > { %p846_p9 = scmp.ne.s32.totalorder %s1107_s25, %s845_s13  ;;  %p854_p6 = scmp.lt.s32.totalorder %s845_s13, %s845_s13 }
  0x21   : > { %p848_p10 = pnand %p846_p9, %p1130_p13  ;;  %p855_p12 = por %p854_p6, %p853_p2 }
  0x23   : > { %p849_p1 = pneg %p848_p10 }
  0x25   : > { %p856_p0 = pnand %p855_p12, %p849_p1 }
  0x27   : > { %859 = shalt.err (!%p856_p0)
}
  0x28   : > { %s1025_s14 = smov 64   ;;  %s1026_s20 = smov 4  }
  0x29   : > { %749 = dma.hbm_to_vmem [thread:$0]  (!%p1114_p11), %s1348_s1, 128, %s1107_s25, [#allocation6], %s1025_s14, %s1025_s14, %s1026_s20  }
  0x2a   : > { %s860_s6 = scalar_lea.hbm %s1349_s2, 128 }
  0x2b   : > { %p861_p1 = scmp.ne.s32.totalorder %s1349_s2, %s860_s6  ;;  %p867_p10 = scmp.lt.u32.totalorder %s860_s6, %s1349_s2 }
  0x2d   : > { %p863_p2 = pnand %p861_p1, %p1130_p13 }
  0x2f   : > { %p864_p6 = pneg %p863_p2 }
  0x31   : > { %p869_p3 = pnand %p867_p10, %p864_p6 }
  0x33   : > { %872 = shalt.err (!%p869_p3)
}
  0x34   : > { %s873_s25 = scalar_lea.vmem %s1118_s28, 128  ;;  %p881_p12 = scmp.lt.s32.totalorder %s1118_s28, %s1118_s28 }
  0x35   : > { %p874_p5 = scmp.ne.s32.totalorder %s1118_s28, %s873_s25  ;;  %p882_p0 = scmp.lt.s32.totalorder %s873_s25, %s873_s25 }
  0x37   : > { %p876_p7 = pnand %p874_p5, %p1130_p13  ;;  %p883_p1 = por %p882_p0, %p881_p12 }
  0x39   : > { %p877_p9 = pneg %p876_p7 }
  0x3b   : > { %p884_p2 = pnand %p883_p1, %p877_p9 }
  0x3d   : > { %887 = shalt.err (!%p884_p2)
}
  0x3e   : > { %752 = dma.hbm_to_vmem [thread:$0]  (!%p1114_p11), %s1349_s2, 128, %s1118_s28, [#allocation6], %s1025_s14, %s1025_s14, %s1026_s20  }
  0x3f   : > { %s888_s29 = scalar_lea.hbm %s1350_s3, 1024 }
  0x40   : > { %p889_p6 = scmp.ne.s32.totalorder %s1350_s3, %s888_s29  ;;  %p895_p5 = scmp.lt.u32.totalorder %s888_s29, %s1350_s3 }
  0x42   : > { %p891_p10 = pnand %p889_p6, %p1130_p13 }
  0x44   : > { %p892_p3 = pneg %p891_p10 }
  0x46   : > { %p897_p7 = pnand %p895_p5, %p892_p3 }
  0x48   : > { %900 = shalt.err (!%p897_p7)
}
  0x49   : > { %s901_s9 = scalar_lea.vmem %s181_s30, 1024  ;;  %p909_p1 = scmp.lt.s32.totalorder %s181_s30, %s181_s30 }
  0x4a   : > { %p902_p9 = scmp.ne.s32.totalorder %s181_s30, %s901_s9  ;;  %p910_p2 = scmp.lt.s32.totalorder %s901_s9, %s901_s9 }
  0x4c   : > { %p904_p12 = pnand %p902_p9, %p1130_p13  ;;  %p911_p4 = por %p910_p2, %p909_p1 }
  0x4e   : > { %p905_p0 = pneg %p904_p12 }
  0x50   : > { %p912_p8 = pnand %p911_p4, %p905_p0 }
  0x52   : > { %915 = shalt.err (!%p912_p8)
}
  0x53   : > { %755 = dma.hbm_to_vmem [thread:$0]  (!%p1114_p11), %s1350_s3, 1024, %s181_s30, [#allocation9], %s1025_s14, %s1025_s14, %s1026_s20  }
  0x54   : > { %s1203_s10 = sadd.s32 1, %s1020_s18   ;;  %s29_s25 = sadd.s32 1, %s1016_s17 }
  0x55   : > { %s26_s26 = ssub.s32 %s1020_s18, %s1203_s10  ;;  %p36_p8 = scmp.ne.s32.totalorder %s1016_s17, %s1012_s16 }
  0x56   : > { %p27_p4 = scmp.eq.s32.totalorder %s26_s26, 0  ;;  %p37_p13 = scmp.eq.s32.totalorder %s1020_s18, 0 }
  0x57   : > { %p767_p6 = scmp.lt.s32.totalorder %s1020_s18, 2  ;;  %p1360_p3 = scmp.eq.s32.totalorder %s1084_s19, 1 }
  0x58   : > { %s1213_s12 = scalar_select %p27_p4, %s1016_s17, %s29_s25  }
  0x59   : > { %p38_p10 = por %p37_p13, %p36_p8  ;;  %p1217_p5 = por %p1360_p3, %p36_p8 }
  0x5a   : > { %s194_s24 = sand.u32 1, %s1016_s17   ;;  %s662_s27 = sshll.u32 %s1020_s18, 7 }
  0x5b   : > { %s661_s30 = sshll.u32 %s194_s24, 3  ;;  %s1226_s29 = scalar_lea.hbm %s1347_s0, %s662_s27 }
  0x5c   : > { %s198_s5 = scalar_lea.vmem [#allocation2], %s661_s30  ;;  %p1228_p11 = pnand %p767_p6, %p38_p10 }
  0x5d   : > { %s205_s6 = sshll.u32 %s198_s5, 4  ;;  %s195_s8 = scalar_lea.sflag [#allocation3], %s194_s24  ;;  %s1232_s6 = int_to_ptr.vmem [resolvable:$true] %s205_s6 }
  0x5e   : > { %s916_s9 = scalar_lea.hbm %s1226_s29, 128  ;;  %p918_p9 = pneg %p1228_p11 }
  0x5f   : > { %p917_p7 = scmp.ne.s32.totalorder %s1226_s29, %s916_s9  ;;  %s921_s26 = scalar_lea.hbm %s1347_s0, 256 }
  0x60   : > { %p922_p1 = scmp.lt.u32.totalorder %s1226_s29, %s1347_s0  ;;  %p923_p2 = scmp.lt.u32.totalorder %s921_s26, %s916_s9 }
  0x61   : > { %p919_p12 = pnand %p918_p9, %p917_p7  ;;  %p925_p8 = scmp.lt.u32.totalorder %s916_s9, %s1226_s29 }
  0x62   : > { %p924_p4 = por %p923_p2, %p922_p1 }
  0x63   : > { %p920_p0 = pneg %p919_p12 }
  0x64   : > { %p926_p13 = por %p925_p8, %p924_p4 }
  0x66   : > { %p927_p6 = pnand %p926_p13, %p920_p0 }
  0x68   : > { %930 = shalt.err (!%p927_p6)
}
  0x69   : > { %s931_s24 = scalar_lea.vmem %s1232_s6, 128  ;;  %s1027_s30 = smov [#allocation2]  }
  0x6a   : > { %p932_p10 = scmp.ne.s32.totalorder %s1232_s6, %s931_s24  ;;  %s936_s14 = sshll.u32 %s1027_s30, 4  ;;  %s937_s14 = int_to_ptr.vmem [resolvable:$false] %s936_s14 }
  0x6b   : > { %s938_s20 = scalar_lea.vmem %s937_s14, 256  ;;  %p939_p12 = scmp.lt.s32.totalorder %s1232_s6, %s937_s14 }
  0x6c   : > { %p934_p3 = pnand %p932_p10, %p918_p9  ;;  %p940_p1 = scmp.lt.s32.totalorder %s938_s20, %s931_s24 }
  0x6e   : > { %p935_p7 = pneg %p934_p3  ;;  %p941_p2 = por %p940_p1, %p939_p12 }
  0x70   : > { %p942_p4 = pnand %p941_p2, %p935_p7 }
  0x72   : > { %945 = shalt.err (!%p942_p4)
}
  0x73   : > { %759 = dma.hbm_to_vmem [thread:$0]  (!%p1228_p11), %s1226_s29, 128, %s1232_s6, %s195_s8  }
  0x74   : > { %p1363_p0 = scmp.ne.s32.totalorder %s1357_s23, 0 }
  0x75   : > { %s1262_s5 = sand.u32 (!%p1363_p0), 1, %s1012_s16   ;;  %p1364_p9 = scmp.ne.s32.totalorder (!%p1363_p0), %s1355_s21, 0 }
  0x76   : > { %214 = sbr.rel (%p1363_p0) target bundleno = 1136 (0x470), region = 36  ;;  %s664_s9 = sshll.u32 (!%p1363_p0), %s1262_s5, 3 }
  0x77   : > { %s217_s28 = scalar_lea.sflag (!%p1363_p0), [#allocation3], %s1262_s5  ;;  %s220_s11 = scalar_lea.vmem (!%p1363_p0), [#allocation2], %s664_s9 }
  0x7d   : > { %991 = dma.done.wait (%p1364_p9), %s217_s28, 128  }
  0x7e   : > { %993 = vsyncadd (%p1364_p9), %s217_s28, 4294967168  ;;  %p1365_p11 = scmp.eq.s32.totalorder %s1084_s19, 0 }
  0x80   : > { %995 = dma.done.wait (%p1365_p11), [#allocation6], 256   ;;  %p1366_p8 = pmov %p1365_p11 }
  0x82   : > { %997 = vsyncadd (%p1366_p8), [#allocation6], 4294967040  ;;  %p1367_p13 = pmov %p1366_p8 }
  0x83   : > { %p1368_p6 = pmov %p1366_p8 }
  0x84   : > { %999 = dma.done.wait (%p1367_p13), [#allocation9], 1024  }
  0x85   : > { %1001 = vsyncadd (%p1368_p6), [#allocation9], 4294966272  ;;  %v1028_v0 = vmov 0.0   ;;  %vm1029_vm0 = vmmov 0   ;;  %v818_v1 = vld [vmem:[#allocation5] sm:$0xff]   ;;  %v1280_v2 = vld [vmem:[%s220_s11] sm:$0xff] }
  0x86   : > { %698 = vmatprep.subr.bf16.mxu1 %v1028_v0  ;;  %700 = vmatprep.mubr.msk.bf16.mxu1 %vm1029_vm0, %v1028_v0  ;;  %vm268_vm1 = vcmask 130048   ;;  %v259_v3 = vpack.c.bf16 %v1280_v2, %v1280_v2  ;;  %v819_v11 = vld [vmem:[#allocation7] sm:$0xff]   ;;  %v820_v12 = vld [vmem:[#allocation8] sm:$0xff]   ;;  %v821_v13 = vld [vmem:[#allocation8 + $0x8] sm:$0xff]   ;;  %s1030_s21 = smov 32   ;;  %s1031_s23 = smov 16  }
  0x87   : > { %710 = vmatprep.subr.bf16.mxu0 %v1028_v0  ;;  %726 = vmatprep.mubr.msk.bf16.mxu0 %vm1029_vm0, %v1028_v0  ;;  %v822_v14 = vld [vmem:[#allocation8 + $0x10] sm:$0xff]   ;;  %v823_v15 = vld [vmem:[#allocation8 + $0x18] sm:$0xff]   ;;  %v824_v16 = vld [vmem:[#allocation8 + $0x20] sm:$0xff]   ;;  %s1032_s29 = smov 48   ;;  %s1033_s6 = smov 80   ;;  %vm525_vm3 = vcmask 261120  }
  0x88   : > { %699 = vmatpush3.bf16.msra.mxu1 %v818_v1  ;;  %711 = vmatpush3.bf16.msra.mxu0 %v820_v12  ;;  %v825_v17 = vld [vmem:[#allocation8 + $0x28] sm:$0xff]   ;;  %v826_v18 = vld [vmem:[#allocation8 + $0x30] sm:$0xff]   ;;  %v827_v31 = vld [vmem:[#allocation8 + $0x38] sm:$0xff]   ;;  %s1034_s7 = smov 64   ;;  %s1035_s8 = smov 112   ;;  %vm527_vm4 = vcmask 392192  }
  0x89   : > { %704 = vmatprep.subr.bf16.mxu1 %v1028_v0  ;;  %712 = vmatprep.subr.bf16.mxu0 %v1028_v0  ;;  %s1036_s26 = smov 96   ;;  %vm529_vm5 = vcmask 523264   ;;  %vm531_vm6 = vcmask 654336   ;;  %vm533_vm7 = vcmask 785408   ;;  %vm535_vm8 = vcmask 916480   ;;  %s682_s25 = sshll.u32 %s1084_s19, 7 }
  0x8a   : > { %506 = vrot.lane.b32.xlu1 %v1280_v2, %s1030_s21  ;;  %s256_s27 = scalar_lea.vmem [#allocation10], %s664_s9  ;;  %s1303_s20 = scalar_lea.hbm %s1351_s4, %s682_s25 }
  0x8b   : > { %701 = vmatmul.mubr.msk.bf16.vlgmr.msra.gmra.mrb[0].mxu1 %vm268_vm1, %v259_v3  ;;  %s556_s24 = sshll.u32 %s256_s27, 4  ;;  %s543_s28 = scalar_lea.sflag [#allocation4], %s1262_s5  ;;  %s1305_s24 = int_to_ptr.vmem [resolvable:$true] %s556_s24 }
  0x8c   : > { %706 = vmatprep.mubr.msk.bf16.mxu1 %vm1029_vm0, %v1028_v0  ;;  %705 = vmatpush3.bf16.msra.mxu1 %v819_v11  ;;  %s946_s11 = scalar_lea.vmem %s1305_s24, 128  ;;  %s1037_s19 = smov [#allocation10]  }
  0x8d   : > { %713 = vmatpush3.bf16.msra.mxu0 %v821_v13  ;;  %p947_p10 = scmp.ne.s32.totalorder %s1305_s24, %s946_s11  ;;  %s950_s9 = sshll.u32 %s1037_s19, 4  ;;  %s951_s9 = int_to_ptr.vmem [resolvable:$false] %s950_s9 }
  0x8e   : > { %714 = vmatprep.subr.bf16.mxu0 %v1028_v0  ;;  %509 = vrot.lane.b32.xlu1 %v1280_v2, %s1032_s29  ;;  %s952_s21 = scalar_lea.vmem %s951_s9, 256  ;;  %p953_p12 = scmp.lt.s32.totalorder %s1305_s24, %s951_s9 }
  0x8f   : > { %p948_p3 = pnand %p947_p10, %p1217_p5  ;;  %p954_p1 = scmp.lt.s32.totalorder %s952_s21, %s946_s11 }
  0x91   : > { %715 = vmatpush3.bf16.msra.mxu0 %v822_v14  ;;  %p949_p7 = pneg %p948_p3  ;;  %p955_p2 = por %p954_p1, %p953_p12 }
  0x92   : > { %716 = vmatprep.subr.bf16.mxu0 %v1028_v0  ;;  %512 = vrot.lane.b32.xlu1 %v1280_v2, %s1034_s7 }
  0x93   : > { %p956_p4 = pnand %p955_p2, %p949_p7 }
  0x95   : > { %717 = vmatpush3.bf16.msra.mxu0 %v823_v15 }
  0x96   : > { %718 = vmatprep.subr.bf16.mxu0 %v1028_v0 }
  0x99   : > { %719 = vmatpush3.bf16.msra.mxu0 %v824_v16 }
  0x9a   : > { %720 = vmatprep.subr.bf16.mxu0 %v1028_v0 }
  0x9d   : > { %721 = vmatpush3.bf16.msra.mxu0 %v825_v17 }
  0x9e   : > { %722 = vmatprep.subr.bf16.mxu0 %v1028_v0 }
  0xa1   : > { %723 = vmatpush3.bf16.msra.mxu0 %v826_v18 }
  0xa2   : > { %724 = vmatprep.subr.bf16.mxu0 %v1028_v0 }
  0xa5   : > { %725 = vmatpush3.bf16.msra.mxu0 %v827_v31 }
  0xfc   : > { %v507_v44 = vpop.permute.xlu1 %506 }
 0x100   : > { %v510_v45 = vpop.permute.xlu1 %509 }
 0x104   : > { %v513_v46 = vpop.permute.xlu1 %512 }
 0x15e   : > { %v306_v4 = vpop.f32.mrb[0].mxu1 }
 0x15f   : > { %v702_v5 = vpop.f32.mrb[1].mxu1  ;;  %v312_v6 = vsel %vm268_vm1, %v306_v4, 0.0  ;;  %v315_v7 = vmul.f32 %v306_v4, %v306_v4 }
 0x160   : > { %313 = vadd.xlane.f32.xlu0 %v312_v6  ;;  %v309_v8 = vpop.f32.mrb[2].mxu1 }
 0x161   : > { %v703_v9 = vpop.f32.mrb[3].mxu1  ;;  %v316_v10 = vsel %vm268_vm1, %v315_v7, 0.0 }
 0x164   : > { %317 = vadd.xlane.f32.xlu0 %v316_v10 }
 0x17a   : > { %503 = vrot.lane.b32.xlu0 %v1280_v2, %s1031_s23 }
 0x17e   : > { %515 = vrot.lane.b32.xlu0 %v1280_v2, %s1033_s6 }
 0x182   : > { %521 = vrot.lane.b32.xlu0 %v1280_v2, %s1035_s8 }
 0x1ed   : > { %v314_v19 = vpop.xlane.xlu0 %313 }
 0x1ee   : > { %v319_v20 = vmul.f32 0.0625, %v314_v19 }
 0x1f0   : > { %v321_v22 = vmul.f32 %v319_v20, %v319_v20  ;;  %v324_v27 = vsub.f32 %v306_v4, %v319_v20 }
 0x1f1   : > { %v318_v21 = vpop.xlane.xlu0 %317 }
 0x1f2   : > { %v320_v23 = vmul.f32 0.0625, %v318_v21 }
 0x1f4   : > { %v322_v24 = vsub.f32 %v320_v23, %v321_v22 }
 0x1f5   : > { %v504_v52 = vpop.permute.xlu0 %503 }
 0x1f6   : > { %v323_v25 = vmax.f32 %v322_v24, 0.0  ;;  %v524_v54 = vsel %vm268_vm1, %v1280_v2, %v504_v52 }
 0x1f7   : > { %v526_v57 = vsel %vm525_vm3, %v524_v54, %v507_v44 }
 0x1f8   : > { %v325_v26 = vadd.f32 1e-05, %v323_v25  ;;  %v528_v58 = vsel %vm527_vm4, %v526_v57, %v510_v45 }
 0x1f9   : > { %v530_v59 = vsel %vm529_vm5, %v528_v58, %v513_v46  ;;  %v516_v60 = vpop.permute.xlu0 %515 }
 0x1fa   : > { %828 = vrsqrt.f32 %v325_v26  ;;  %v532_v62 = vsel %vm531_vm6, %v530_v59, %v516_v60 }
 0x1fd   : > { %v522_v1 = vpop.permute.xlu0 %521 }
 0x204   : > { %v829_v28 = vpop.eup %828 }
 0x205   : > { %v327_v29 = vmul.f32 %v829_v28, %v324_v27 }
 0x207   : > { %v328_v30 = vpack.c.bf16 %v327_v29, %v327_v29 }
 0x209   : > { %707 = vmatmul.mubr.msk.bf16.vlgmr.msra.gmra.mrb[4].mxu1 %vm268_vm1, %v328_v30 }
 0x2dc   : > { %v374_v32 = vpop.f32.mrb[4].mxu1 }
 0x2dd   : > { %vm380_vm2 = vcmp.gt.f32.partialorder %v374_v32, 0.0  ;;  %v381_v33 = vmul.f32 0.01, %v374_v32  ;;  %v708_v34 = vpop.f32.mrb[5].mxu1 }
 0x2de   : > { %v377_v35 = vpop.f32.mrb[6].mxu1 }
 0x2df   : > { %v382_v36 = vsel %vm380_vm2, %v374_v32, %v381_v33  ;;  %v709_v37 = vpop.f32.mrb[7].mxu1 }
 0x2e0   : > { %v383_v38 = vpack.c.bf16 %v382_v36, %v382_v36 }
 0x2e2   : > { %727 = vmatmul.mubr.bf16.vlgmr.msra.gmra.mrb[0].mxu0 %v383_v38 }
 0x3b5   : > { %v482_v39 = vpop.f32.mrb[0].mxu0 }
 0x3b6   : > { %488 = vadd.xlane.f32.xlu1 %v482_v39  ;;  %v728_v40 = vpop.f32.mrb[1].mxu0  ;;  %v490_v43 = vmul.f32 %v482_v39, %v482_v39 }
 0x3b7   : > { %v485_v41 = vpop.f32.mrb[2].mxu0 }
 0x3b8   : > { %v729_v42 = vpop.f32.mrb[3].mxu0 }
 0x3ba   : > { %491 = vadd.xlane.f32.xlu1 %v490_v43 }
 0x3cb   : > { %518 = vrot.lane.b32.xlu1 %v1280_v2, %s1036_s26 }
 0x443   : > { %v489_v47 = vpop.xlane.xlu1 %488 }
 0x444   : > { %v493_v48 = vmul.f32 0.020833334, %v489_v47 }
 0x446   : > { %v495_v50 = vmul.f32 %v493_v48, %v493_v48  ;;  %v498_v63 = vsub.f32 %v482_v39, %v493_v48 }
 0x447   : > { %v492_v49 = vpop.xlane.xlu1 %491 }
 0x448   : > { %v494_v51 = vmul.f32 0.020833334, %v492_v49 }
 0x44a   : > { %v496_v53 = vsub.f32 %v494_v51, %v495_v50 }
 0x44b   : > { %v519_v61 = vpop.permute.xlu1 %518 }
 0x44c   : > { %v497_v55 = vmax.f32 %v496_v53, 0.0  ;;  %v534_v0 = vsel %vm533_vm7, %v532_v62, %v519_v61 }
 0x44d   : > { %v536_v4 = vsel %vm535_vm8, %v534_v0, %v522_v1 }
 0x44e   : > { %v499_v56 = vadd.f32 1e-05, %v497_v55 }
 0x450   : > { %830 = vrsqrt.f32 %v499_v56 }
 0x45a   : > { %v831_v2 = vpop.eup %830 }
 0x45b   : > { %v501_v3 = vmul.f32 %v831_v2, %v498_v63 }
 0x45d   : > { %v537_v5 = vadd.f32 %v536_v4, %v501_v3 }
 0x45f   : > { %vm538_vm9 = vcmp.gt.f32.partialorder %v537_v5, 0.0  ;;  %v539_v6 = vmul.f32 0.01, %v537_v5 }
 0x461   : > { %v540_v7 = vsel %vm538_vm9, %v537_v5, %v539_v6 }
 0x462   : > { %541 = vst [vmem:[%s256_s27] sm:$0xff] %v540_v7 }
 0x463   : > { %959 = shalt.err (!%p956_p4)
}
 0x464   : > { %s960_s5 = scalar_lea.hbm %s1303_s20, 128  ;;  %s964_s6 = scalar_lea.hbm %s1351_s4, 256 }
 0x465   : > { %p961_p0 = scmp.ne.s32.totalorder %s1303_s20, %s960_s5  ;;  %p965_p8 = scmp.lt.u32.totalorder %s1303_s20, %s1351_s4 }
 0x466   : > { %p966_p13 = scmp.lt.u32.totalorder %s964_s6, %s960_s5  ;;  %p968_p10 = scmp.lt.u32.totalorder %s960_s5, %s1303_s20 }
 0x467   : > { %p962_p9 = pnand %p961_p0, %p1217_p5 }
 0x468   : > { %p967_p6 = por %p966_p13, %p965_p8 }
 0x469   : > { %p963_p11 = pneg %p962_p9 }
 0x46a   : > { %p969_p3 = por %p968_p10, %p967_p6 }
 0x46c   : > { %p970_p7 = pnand %p969_p3, %p963_p11 }
 0x46e   : > { %973 = shalt.err (!%p970_p7)
}
 0x46f   : > { %744 = dma.vmem_to_hbm [thread:$0]  (%p1217_p5), %s1305_s24, 128, %s1303_s20, %s543_s28  }
 0x470 PF: > { %s568_s26 = sand.u32 1, %s1008_s15   ;;  %p1369_p12 = scmp.ne.s32.totalorder %s1356_s22, 0 }
 0x471   : > { %p1370_p1 = scmp.ge.s32.totalorder %s1020_s18, 2  ;;  %s569_s25 = scalar_lea.sflag [#allocation4], %s568_s26 }
 0x473   : > { %p761_p2 = pnand %p1370_p1, %p1369_p12 }
 0x475   : > { %1003 = dma.done.wait (!%p761_p2), %s569_s25, 128  }
 0x476   : > { %1005 = vsyncadd (!%p761_p2), %s569_s25, 4294967168  ;;  %p19_p4 = scmp.ge.s32.totalorder %s1203_s10, 4   ;;  %s1371_s15 = smov %s1012_s16 }
 0x477   : > { %s1372_s16 = smov %s1016_s17  ;;  %s1373_s17 = smov %s1213_s12 }
 0x478   : > { %s1374_s18 = smov %s1203_s10  ;;  %21 = sbr.rel (!%p19_p4) target bundleno = 7 (0x7), region = 93 }
 0x47f   :  { %574 = vsyncpa [#allocation3], 1 }
 0x480   :  { %576 = vsyncpa [#allocation3 + $0x1], 1 }
 0x481   :  { %577 = vsyncpa [#allocation6], 1 }
 0x482   :  { %578 = vsyncpa [#allocation9], 1 }
 0x483   :  { %579 = vsyncpa [#allocation4], 1 }
 0x484   :  { %581 = vsyncpa [#allocation4 + $0x1], 1 }

</bundles_post_ra>
